<compile_context>
chip_gen: v6e
topology: v6e:2x2x1
jax: 0.10.0
libtpu: 0.0.40
codegen_flags: <defaults>
</compile_context>

<pallas_src>
import functools
from itertools import combinations

import numpy as np
import jax
import jax.numpy as jnp
from jax.experimental import pallas as pl
from jax.experimental.pallas import tpu as pltpu

BN_EPS = 1e-5


# ----------------------------------------------------------------------------
# Single fused kernel.
#   x_ref     [B, G*Dx]      input batch (f32)
#   slab_ref  [R, L]         packed constant slab (f32), L = G*H1, regions:
#       w0a  [G*Dx, L]   block-diag first-layer weights, pool partner 0
#       w0b  [G*Dx, L]   pool partner 1
#       w1   [L, L]      block-diag second-layer weights (cols GH:L zero)
#       wz0a [L, L]      hz first layer, partner 0 (rows GH:L zero)
#       wz0b [L, L]      partner 1
#       wz1  [L, L]      hz second layer (cols GH:L zero)
#       bigw [L, L]      pairwise bilinear block matrix (rows/cols GH:L zero)
#       misc [8, L]      rows: b0a, b0b, bz0a, bz0b, zw0, zw1, 0, 0
# outputs:
#   logits_ref [B, 1]
#   hout_ref   [2, B, L]     slot 0 = h_bn (lanes GH:L zero), slot 1 = h_nonlin
# ----------------------------------------------------------------------------
def _fused_kernel(x_ref, slab_ref, logits_ref, hout_ref, *,
                  off, gdx, lanes, pb, bias, pw0, pw1):
    f32 = jnp.float32
    bf16 = jnp.bfloat16
    L = lanes

    def mm(a, b):
        # bf16 operands -> single-pass MXU; f32 accumulation keeps downstream math f32
        return jnp.dot(a.astype(bf16), b.astype(bf16), preferred_element_type=f32)

    def bn(h):  # training-mode BatchNorm1d (biased variance, identity affine)
        mu = jnp.mean(h, axis=0, keepdims=True)
        var = jnp.mean((h - mu) ** 2, axis=0, keepdims=True)
        return (h - mu) * jax.lax.rsqrt(var + BN_EPS)

    x = x_ref[...]

    # static slices of the constant slab (8-aligned row offsets; free views)
    W0A  = slab_ref[off['w0a']:off['w0a'] + gdx, :]
    W0B  = slab_ref[off['w0b']:off['w0b'] + gdx, :]
    W1   = slab_ref[off['w1']:off['w1'] + L, :]
    Wz0A = slab_ref[off['wz0a']:off['wz0a'] + L, :]
    Wz0B = slab_ref[off['wz0b']:off['wz0b'] + L, :]
    Wz1  = slab_ref[off['wz1']:off['wz1'] + L, :]
    BigW = slab_ref[off['bigw']:off['bigw'] + L, :]
    misc = slab_ref[off['misc']:off['misc'] + 8, :]
    b0a, b0b   = misc[0:1, :], misc[1:2, :]
    bz0a, bz0b = misc[2:3, :], misc[3:4, :]
    zw0, zw1   = misc[4:5, :], misc[5:6, :]

    # ---- h path: Linear -> maxout(2) -> Linear(no bias) -> BN ----------------
    hm  = jnp.maximum(mm(x, W0A) + b0a, mm(x, W0B) + b0b)     # maxout via 2 dots + VPU max
    hbn = bn(mm(hm, W1))                                       # [B, L], lanes GH:L == 0

    # ---- hz path (input = h_bn) ----------------------------------------------
    hzm  = jnp.maximum(mm(hbn, Wz0A) + bz0a, mm(hbn, Wz0B) + bz0b)
    hzbn = bn(mm(hzm, Wz1))                                     # [B, L], lanes GH:L == 0

    # ---- shared gauss-maxout phi (pw / pb are compile-time constants) --------
    d  = hbn - pb
    hn = jnp.maximum(pw0 * d, pw1 * d)

    hout_ref[0, :, :] = hbn
    hout_ref[1, :, :] = hn

    # ---- pairwise bilinear logits + z term: one dot + one lane row-sum -------
    t = mm(hn, BigW)                                            # [B, L] (pad lanes 0)
    acc = t * hbn + zw0 * hzbn * hzbn + zw1 * hzbn              # pad lanes stay 0
    logits_ref[...] = jnp.sum(acc, axis=1, keepdims=True) + bias   # [B, 1]


# ----------------------------------------------------------------------------
# Net (gauss-maxout, phi_share=True, pool_size=2, len(h_sizes) == 2)
# ----------------------------------------------------------------------------
class NetPallas:
    def __init__(self, h_sizes, num_group, num_xdim, pool_size=2, key=None):
        assert pool_size == 2 and len(h_sizes) == 2
        self.G = num_group
        self.H1 = h_sizes[0]
        self.H = h_sizes[-1]
        self.num_xdim = list(num_xdim)
        assert all(d == self.H for d in self.num_xdim), "num_xdim must equal num_hdim"
        self.combs = tuple(combinations(range(num_group), 2))
        C = len(self.combs)
        P = self.H1 * 2
        G, H, H1 = self.G, self.H, self.H1
        Dx = self.num_xdim[0]

        keys = jax.random.split(key, 16)

        def u(k, shape, s=0.3):
            return jax.random.uniform(k, shape, jnp.float32, -s, s)

        # "PyTorch-layout" parameters (used by the pure-JAX reference)
        self.W0 = u(keys[0], (G, Dx, P))
        self.b0 = u(keys[1], (G, P), 0.1)
        self.W1 = u(keys[2], (G, H1, H))
        self.Wz0 = u(keys[3], (G, H, P))
        self.bz0 = u(keys[4], (G, P), 0.1)
        self.Wz1 = u(keys[5], (G, H1, H))
        # phi / readout parameters (module zero-inits these; random here for a
        # non-trivial compute path — still deterministic).
        self.w = u(keys[6], (H, H, 2, C), 0.1)
        self.zw = u(keys[7], (G, H, 2), 0.1)
        self.pw = jnp.asarray([[1.0, -0.7]], jnp.float32)    # [1, 2]
        self.pb = u(keys[8], (1,), 0.1)
        self.b = u(keys[9], (1,), 0.1)

        # compile-time scalar constants for the kernel (no SMEM operands)
        self.pw_f = (1.0, -0.7)
        self.pb_f = float(self.pb[0])
        self.b_f = float(self.b[0])

        # ---- kernel-friendly packed constant slab (built once at init) -------
        GDx = G * Dx
        GH1 = G * H1
        GH = G * H
        L = GH1
        assert GH <= L, "packing assumes G*H <= G*H1"
        self.L = L

        def block_diag(mats):
            n = len(mats)
            r, c = mats[0].shape
            out = np.zeros((n * r, n * c), np.float32)
            for g, m in enumerate(mats):
                out[g * r:(g + 1) * r, g * c:(g + 1) * c] = m
            return out

        def pad_to(mat, rows, cols):
            out = np.zeros((rows, cols), np.float32)
            out[:mat.shape[0], :mat.shape[1]] = mat
            return out

        W0_np, b0_np = np.asarray(self.W0), np.asarray(self.b0)
        W1_np = np.asarray(self.W1)
        Wz0_np, bz0_np = np.asarray(self.Wz0), np.asarray(self.bz0)
        Wz1_np = np.asarray(self.Wz1)
        w_np = np.asarray(self.w)
        zw_np = np.asarray(self.zw)

        # maxout pool partners of output unit i are columns (2i, 2i+1)
        W0A = block_diag([W0_np[g][:, 0::2] for g in range(G)])    # [GDx, L]
        W0B = block_diag([W0_np[g][:, 1::2] for g in range(G)])
        W1b = block_diag([W1_np[g] for g in range(G)])             # [L, GH]
        Wz0A = block_diag([Wz0_np[g][:, 0::2] for g in range(G)])  # [GH, L]
        Wz0B = block_diag([Wz0_np[g][:, 1::2] for g in range(G)])
        Wz1b = block_diag([Wz1_np[g] for g in range(G)])           # [L, GH]

        # block matrix for the pairwise bilinear term:
        #   rowsum( (hn_flat @ BigW) * hbn_flat )
        #     == sum_c sum_{i,j} w[i,j,0,c] hn[:,a,i] hbn[:,b,j]
        #              + w[i,j,1,c] hn[:,b,i] hbn[:,a,j]
        bigw = np.zeros((GH, GH), np.float32)
        for c, (a, b) in enumerate(self.combs):
            bigw[a * H:(a + 1) * H, b * H:(b + 1) * H] = w_np[:, :, 0, c]
            bigw[b * H:(b + 1) * H, a * H:(a + 1) * H] = w_np[:, :, 1, c]

        misc = np.zeros((8, L), np.float32)
        misc[0, :L] = np.concatenate([b0_np[g][0::2] for g in range(G)])
        misc[1, :L] = np.concatenate([b0_np[g][1::2] for g in range(G)])
        misc[2, :L] = np.concatenate([bz0_np[g][0::2] for g in range(G)])
        misc[3, :L] = np.concatenate([bz0_np[g][1::2] for g in range(G)])
        misc[4, :GH] = zw_np[:, :, 0].reshape(GH)
        misc[5, :GH] = zw_np[:, :, 1].reshape(GH)

        regions = [
            ('w0a', W0A),
            ('w0b', W0B),
            ('w1', pad_to(W1b, L, L)),
            ('wz0a', pad_to(Wz0A, L, L)),
            ('wz0b', pad_to(Wz0B, L, L)),
            ('wz1', pad_to(Wz1b, L, L)),
            ('bigw', pad_to(bigw, L, L)),
            ('misc', misc),
        ]
        off = {}
        chunks = []
        r = 0
        for name, mat in regions:
            off[name] = r
            nrows = ((mat.shape[0] + 7) // 8) * 8          # keep every region 8-aligned
            chunks.append(pad_to(mat, nrows, L))
            r += nrows
        self.off = off
        self.slab = jnp.asarray(np.concatenate(chunks, axis=0))   # single constant slab

    def forward(self, x):
        """x: [batch, group, dim] -> (logits [B], h_bn [B,G,H], h_nonlin [B,G,H,1])"""
        B, G, Dx = x.shape
        H, L = self.H, self.L
        GH = G * H
        x_flat = x.reshape(B, G * Dx).astype(jnp.float32)

        vmem = pl.BlockSpec(memory_space=pltpu.MemorySpace.VMEM)

        kernel = functools.partial(
            _fused_kernel, off=self.off, gdx=G * Dx, lanes=L,
            pb=self.pb_f, bias=self.b_f, pw0=self.pw_f[0], pw1=self.pw_f[1])

        logits_col, hout = pl.pallas_call(
            kernel,
            out_shape=(
                jax.ShapeDtypeStruct((B, 1), jnp.float32),     # logits, no tail relayout
                jax.ShapeDtypeStruct((2, B, L), jnp.float32),  # [h_bn | h_nonlin] slab
            ),
            in_specs=[vmem, vmem],
            out_specs=(vmem, vmem),
        )(x_flat, self.slab)

        logits = logits_col[:, 0]
        h_bn = hout[0, :, :GH].reshape(B, G, H)
        h_nonlin = hout[1, :, :GH].reshape(B, G, H)[:, :, :, None]
        return logits, h_bn, h_nonlin


# ----------------------------------------------------------------------------
# Pure-JAX reference (direct transcription of the PyTorch forward) for checking
# ----------------------------------------------------------------------------
def reference_forward(net, x):
    B, G, _ = x.shape

    def bn(h):
        mu = jnp.mean(h, axis=0, keepdims=True)
        var = jnp.mean((h - mu) ** 2, axis=0, keepdims=True)
        return (h - mu) * jax.lax.rsqrt(var + BN_EPS)

    h_bn = []
    for m in range(G):
        hm = x[:, m, :] @ net.W0[m] + net.b0[m]
        hm = jnp.max(hm.reshape(B, -1, 2), axis=-1)
        hm = hm @ net.W1[m]
        h_bn.append(bn(hm))
    h_bn = jnp.stack(h_bn, axis=1)                                  # [B, G, H]

    h_nonlin = jnp.max(net.pw[None, None, None, :, :] *
                       (h_bn[:, :, :, None, None] - net.pb[None, None, None, :, None]),
                       axis=-1)                                     # [B, G, H, 1]
    logits = jnp.zeros((B,), jnp.float32)
    for c, (a, b) in enumerate(net.combs):
        phi_ab = h_bn[:, b, None, :] * h_nonlin[:, a, :, 0, None]
        phi_ba = h_bn[:, a, None, :] * h_nonlin[:, b, :, 0, None]
        logits = logits + jnp.sum(net.w[None, :, :, 0, c] * phi_ab +
                                  net.w[None, :, :, 1, c] * phi_ba, axis=(1, 2))
    hz_bn = []
    for m in range(G):
        hzm = h_bn[:, m, :] @ net.Wz0[m] + net.bz0[m]
        hzm = jnp.max(hzm.reshape(B, -1, 2), axis=-1)
        hzm = hzm @ net.Wz1[m]
        hz_bn.append(bn(hzm))
    hz_bn = jnp.stack(hz_bn, axis=1)
    logits_z = jnp.sum(net.zw[None, :, :, 0] * hz_bn ** 2 +
                       net.zw[None, :, :, 1] * hz_bn, axis=(1, 2))
    logits = logits + logits_z + net.b[0]
    return logits, h_bn, h_nonlin


if __name__ == "__main__":
    key = jax.random.PRNGKey(0)
    k_param, k_x = jax.random.split(key)

    B, G, D = 8, 3, 8
    h_sizes = [16, 8]
    net = NetPallas(h_sizes, num_group=G, num_xdim=[D] * G, pool_size=2, key=k_param)

    x = jax.random.normal(k_x, (B, G, D), jnp.float32)

    logits, h_bn, h_nonlin = net.forward(x)
    jax.block_until_ready((logits, h_bn, h_nonlin))

    # Correctness check against the straight-line f32 JAX transcription.
    # Tolerance relaxed from 1e-3 to 2e-2 because the kernel now feeds the MXU
    # bf16 operands (per performance review); accumulation stays f32.
    ref_logits, ref_h_bn, ref_h_nonlin = reference_forward(net, x)
    np.testing.assert_allclose(np.asarray(h_bn), np.asarray(ref_h_bn), rtol=2e-2, atol=2e-2)
    np.testing.assert_allclose(np.asarray(h_nonlin), np.asarray(ref_h_nonlin), rtol=2e-2, atol=2e-2)
    np.testing.assert_allclose(np.asarray(logits), np.asarray(ref_logits), rtol=2e-2, atol=2e-2)

    print("KERNEL_OK")
</pallas_src>

<mosaic_0001>
module attributes {stable_mosaic.version = 11 : i64} {
  func.func @_fused_kernel(%arg0: memref<8x24xf32, #tpu.memory_space<vmem>>, %arg1: memref<296x48xf32, #tpu.memory_space<vmem>>, %arg2: memref<8x1xf32, #tpu.memory_space<vmem>>, %arg3: memref<2x8x48xf32, #tpu.memory_space<vmem>>) attributes {dimension_semantics = [], scalar_prefetch = 0 : i64, scratch_operands = 0 : i64, tpu.core_type = #tpu.core_type<tc>} {
    %c0 = arith.constant 0 : index
    %c0_0 = arith.constant 0 : index
    %0 = vector.load %arg0[%c0, %c0_0] : memref<8x24xf32, #tpu.memory_space<vmem>>, vector<8x24xf32>
    %c0_1 = arith.constant 0 : index
    %c0_2 = arith.constant 0 : index
    %1 = vector.load %arg1[%c0_1, %c0_2] : memref<296x48xf32, #tpu.memory_space<vmem>>, vector<24x48xf32>
    %c24 = arith.constant 24 : index
    %c0_3 = arith.constant 0 : index
    %2 = vector.load %arg1[%c24, %c0_3] : memref<296x48xf32, #tpu.memory_space<vmem>>, vector<24x48xf32>
    %c48 = arith.constant 48 : index
    %c0_4 = arith.constant 0 : index
    %3 = vector.load %arg1[%c48, %c0_4] : memref<296x48xf32, #tpu.memory_space<vmem>>, vector<48x48xf32>
    %c96 = arith.constant 96 : index
    %c0_5 = arith.constant 0 : index
    %4 = vector.load %arg1[%c96, %c0_5] : memref<296x48xf32, #tpu.memory_space<vmem>>, vector<48x48xf32>
    %c144 = arith.constant 144 : index
    %c0_6 = arith.constant 0 : index
    %5 = vector.load %arg1[%c144, %c0_6] : memref<296x48xf32, #tpu.memory_space<vmem>>, vector<48x48xf32>
    %c192 = arith.constant 192 : index
    %c0_7 = arith.constant 0 : index
    %6 = vector.load %arg1[%c192, %c0_7] : memref<296x48xf32, #tpu.memory_space<vmem>>, vector<48x48xf32>
    %c240 = arith.constant 240 : index
    %c0_8 = arith.constant 0 : index
    %7 = vector.load %arg1[%c240, %c0_8] : memref<296x48xf32, #tpu.memory_space<vmem>>, vector<48x48xf32>
    %c288 = arith.constant 288 : index
    %c0_9 = arith.constant 0 : index
    %8 = vector.load %arg1[%c288, %c0_9] : memref<296x48xf32, #tpu.memory_space<vmem>>, vector<8x48xf32>
    %9 = vector.extract_strided_slice %8 {offsets = [0, 0], sizes = [1, 48], strides = [1, 1]} : vector<8x48xf32> to vector<1x48xf32>
    %10 = vector.extract_strided_slice %8 {offsets = [1, 0], sizes = [1, 48], strides = [1, 1]} : vector<8x48xf32> to vector<1x48xf32>
    %11 = vector.extract_strided_slice %8 {offsets = [2, 0], sizes = [1, 48], strides = [1, 1]} : vector<8x48xf32> to vector<1x48xf32>
    %12 = vector.extract_strided_slice %8 {offsets = [3, 0], sizes = [1, 48], strides = [1, 1]} : vector<8x48xf32> to vector<1x48xf32>
    %13 = vector.extract_strided_slice %8 {offsets = [4, 0], sizes = [1, 48], strides = [1, 1]} : vector<8x48xf32> to vector<1x48xf32>
    %14 = vector.extract_strided_slice %8 {offsets = [5, 0], sizes = [1, 48], strides = [1, 1]} : vector<8x48xf32> to vector<1x48xf32>
    %15 = arith.truncf %0 : vector<8x24xf32> to vector<8x24xbf16>
    %16 = arith.truncf %1 : vector<24x48xf32> to vector<24x48xbf16>
    %cst = arith.constant dense<0.000000e+00> : vector<8x48xf32>
    %17 = tpu.matmul %15, %16, %cst {dimension_numbers = #tpu.dot_dimension_numbers<[1], [0], [0], [1], [0, 0, 1, 1], [], []>} : vector<8x24xbf16>, vector<24x48xbf16>, vector<8x48xf32> -> vector<8x48xf32>
    %18 = vector.broadcast %9 : vector<1x48xf32> to vector<8x48xf32>
    %19 = arith.addf %17, %18 : vector<8x48xf32>
    %20 = arith.truncf %0 : vector<8x24xf32> to vector<8x24xbf16>
    %21 = arith.truncf %2 : vector<24x48xf32> to vector<24x48xbf16>
    %cst_10 = arith.constant dense<0.000000e+00> : vector<8x48xf32>
    %22 = tpu.matmul %20, %21, %cst_10 {dimension_numbers = #tpu.dot_dimension_numbers<[1], [0], [0], [1], [0, 0, 1, 1], [], []>} : vector<8x24xbf16>, vector<24x48xbf16>, vector<8x48xf32> -> vector<8x48xf32>
    %23 = vector.broadcast %10 : vector<1x48xf32> to vector<8x48xf32>
    %24 = arith.addf %22, %23 : vector<8x48xf32>
    %25 = arith.maximumf %19, %24 : vector<8x48xf32>
    %26 = arith.truncf %25 : vector<8x48xf32> to vector<8x48xbf16>
    %27 = arith.truncf %3 : vector<48x48xf32> to vector<48x48xbf16>
    %cst_11 = arith.constant dense<0.000000e+00> : vector<8x48xf32>
    %28 = tpu.matmul %26, %27, %cst_11 {dimension_numbers = #tpu.dot_dimension_numbers<[1], [0], [0], [1], [0, 0, 1, 1], [], []>} : vector<8x48xbf16>, vector<48x48xbf16>, vector<8x48xf32> -> vector<8x48xf32>
    %cst_12 = arith.constant dense<0.000000e+00> : vector<48xf32>
    %29 = vector.multi_reduction <add>, %28, %cst_12 [0] : vector<8x48xf32> to vector<48xf32>
    %30 = vector.shape_cast %29 : vector<48xf32> to vector<1x48xf32>
    %cst_13 = arith.constant 8.000000e+00 : f32
    %31 = vector.broadcast %cst_13 : f32 to vector<1x48xf32>
    %32 = arith.divf %30, %31 : vector<1x48xf32>
    %33 = vector.broadcast %32 : vector<1x48xf32> to vector<8x48xf32>
    %34 = arith.subf %28, %33 : vector<8x48xf32>
    %35 = arith.mulf %34, %34 : vector<8x48xf32>
    %cst_14 = arith.constant dense<0.000000e+00> : vector<48xf32>
    %36 = vector.multi_reduction <add>, %35, %cst_14 [0] : vector<8x48xf32> to vector<48xf32>
    %37 = vector.shape_cast %36 : vector<48xf32> to vector<1x48xf32>
    %cst_15 = arith.constant 8.000000e+00 : f32
    %38 = vector.broadcast %cst_15 : f32 to vector<1x48xf32>
    %39 = arith.divf %37, %38 : vector<1x48xf32>
    %40 = vector.broadcast %32 : vector<1x48xf32> to vector<8x48xf32>
    %41 = arith.subf %28, %40 : vector<8x48xf32>
    %cst_16 = arith.constant 9.99999974E-6 : f32
    %42 = vector.broadcast %cst_16 : f32 to vector<1x48xf32>
    %43 = arith.addf %39, %42 : vector<1x48xf32>
    %44 = math.rsqrt %43 : vector<1x48xf32>
    %45 = vector.broadcast %44 : vector<1x48xf32> to vector<8x48xf32>
    %46 = arith.mulf %41, %45 : vector<8x48xf32>
    %47 = arith.truncf %46 : vector<8x48xf32> to vector<8x48xbf16>
    %48 = arith.truncf %4 : vector<48x48xf32> to vector<48x48xbf16>
    %cst_17 = arith.constant dense<0.000000e+00> : vector<8x48xf32>
    %49 = tpu.matmul %47, %48, %cst_17 {dimension_numbers = #tpu.dot_dimension_numbers<[1], [0], [0], [1], [0, 0, 1, 1], [], []>} : vector<8x48xbf16>, vector<48x48xbf16>, vector<8x48xf32> -> vector<8x48xf32>
    %50 = vector.broadcast %11 : vector<1x48xf32> to vector<8x48xf32>
    %51 = arith.addf %49, %50 : vector<8x48xf32>
    %52 = arith.truncf %46 : vector<8x48xf32> to vector<8x48xbf16>
    %53 = arith.truncf %5 : vector<48x48xf32> to vector<48x48xbf16>
    %cst_18 = arith.constant dense<0.000000e+00> : vector<8x48xf32>
    %54 = tpu.matmul %52, %53, %cst_18 {dimension_numbers = #tpu.dot_dimension_numbers<[1], [0], [0], [1], [0, 0, 1, 1], [], []>} : vector<8x48xbf16>, vector<48x48xbf16>, vector<8x48xf32> -> vector<8x48xf32>
    %55 = vector.broadcast %12 : vector<1x48xf32> to vector<8x48xf32>
    %56 = arith.addf %54, %55 : vector<8x48xf32>
    %57 = arith.maximumf %51, %56 : vector<8x48xf32>
    %58 = arith.truncf %57 : vector<8x48xf32> to vector<8x48xbf16>
    %59 = arith.truncf %6 : vector<48x48xf32> to vector<48x48xbf16>
    %cst_19 = arith.constant dense<0.000000e+00> : vector<8x48xf32>
    %60 = tpu.matmul %58, %59, %cst_19 {dimension_numbers = #tpu.dot_dimension_numbers<[1], [0], [0], [1], [0, 0, 1, 1], [], []>} : vector<8x48xbf16>, vector<48x48xbf16>, vector<8x48xf32> -> vector<8x48xf32>
    %cst_20 = arith.constant dense<0.000000e+00> : vector<48xf32>
    %61 = vector.multi_reduction <add>, %60, %cst_20 [0] : vector<8x48xf32> to vector<48xf32>
    %62 = vector.shape_cast %61 : vector<48xf32> to vector<1x48xf32>
    %cst_21 = arith.constant 8.000000e+00 : f32
    %63 = vector.broadcast %cst_21 : f32 to vector<1x48xf32>
    %64 = arith.divf %62, %63 : vector<1x48xf32>
    %65 = vector.broadcast %64 : vector<1x48xf32> to vector<8x48xf32>
    %66 = arith.subf %60, %65 : vector<8x48xf32>
    %67 = arith.mulf %66, %66 : vector<8x48xf32>
    %cst_22 = arith.constant dense<0.000000e+00> : vector<48xf32>
    %68 = vector.multi_reduction <add>, %67, %cst_22 [0] : vector<8x48xf32> to vector<48xf32>
    %69 = vector.shape_cast %68 : vector<48xf32> to vector<1x48xf32>
    %cst_23 = arith.constant 8.000000e+00 : f32
    %70 = vector.broadcast %cst_23 : f32 to vector<1x48xf32>
    %71 = arith.divf %69, %70 : vector<1x48xf32>
    %72 = vector.broadcast %64 : vector<1x48xf32> to vector<8x48xf32>
    %73 = arith.subf %60, %72 : vector<8x48xf32>
    %cst_24 = arith.constant 9.99999974E-6 : f32
    %74 = vector.broadcast %cst_24 : f32 to vector<1x48xf32>
    %75 = arith.addf %71, %74 : vector<1x48xf32>
    %76 = math.rsqrt %75 : vector<1x48xf32>
    %77 = vector.broadcast %76 : vector<1x48xf32> to vector<8x48xf32>
    %78 = arith.mulf %73, %77 : vector<8x48xf32>
    %cst_25 = arith.constant -0.0372727886 : f32
    %79 = vector.broadcast %cst_25 : f32 to vector<8x48xf32>
    %80 = arith.subf %46, %79 : vector<8x48xf32>
    %cst_26 = arith.constant 1.000000e+00 : f32
    %81 = vector.broadcast %cst_26 : f32 to vector<8x48xf32>
    %82 = arith.mulf %81, %80 : vector<8x48xf32>
    %cst_27 = arith.constant -0.699999988 : f32
    %83 = vector.broadcast %cst_27 : f32 to vector<8x48xf32>
    %84 = arith.mulf %83, %80 : vector<8x48xf32>
    %85 = arith.maximumf %82, %84 : vector<8x48xf32>
    %c0_28 = arith.constant 0 : index
    %c0_29 = arith.constant 0 : index
    %c0_30 = arith.constant 0 : index
    %86 = vector.load %arg3[%c0_28, %c0_29, %c0_30] : memref<2x8x48xf32, #tpu.memory_space<vmem>>, vector<1x8x48xf32>
    %87 = vector.shape_cast %86 : vector<1x8x48xf32> to vector<8x48xf32>
    %88 = vector.shape_cast %46 : vector<8x48xf32> to vector<1x8x48xf32>
    tpu.vector_store %arg3[%c0_28, %c0_29, %c0_30], %88 {strides = array<i32>} : memref<2x8x48xf32, #tpu.memory_space<vmem>>, vector<1x8x48xf32>,
    %c1 = arith.constant 1 : index
    %c0_31 = arith.constant 0 : index
    %c0_32 = arith.constant 0 : index
    %89 = vector.load %arg3[%c1, %c0_31, %c0_32] : memref<2x8x48xf32, #tpu.memory_space<vmem>>, vector<1x8x48xf32>
    %90 = vector.shape_cast %89 : vector<1x8x48xf32> to vector<8x48xf32>
    %91 = vector.shape_cast %85 : vector<8x48xf32> to vector<1x8x48xf32>
    tpu.vector_store %arg3[%c1, %c0_31, %c0_32], %91 {strides = array<i32>} : memref<2x8x48xf32, #tpu.memory_space<vmem>>, vector<1x8x48xf32>,
    %92 = arith.truncf %85 : vector<8x48xf32> to vector<8x48xbf16>
    %93 = arith.truncf %7 : vector<48x48xf32> to vector<48x48xbf16>
    %cst_33 = arith.constant dense<0.000000e+00> : vector<8x48xf32>
    %94 = tpu.matmul %92, %93, %cst_33 {dimension_numbers = #tpu.dot_dimension_numbers<[1], [0], [0], [1], [0, 0, 1, 1], [], []>} : vector<8x48xbf16>, vector<48x48xbf16>, vector<8x48xf32> -> vector<8x48xf32>
    %95 = arith.mulf %94, %46 : vector<8x48xf32>
    %96 = vector.broadcast %13 : vector<1x48xf32> to vector<8x48xf32>
    %97 = arith.mulf %96, %78 : vector<8x48xf32>
    %98 = arith.mulf %97, %78 : vector<8x48xf32>
    %99 = arith.addf %95, %98 : vector<8x48xf32>
    %100 = vector.broadcast %14 : vector<1x48xf32> to vector<8x48xf32>
    %101 = arith.mulf %100, %78 : vector<8x48xf32>
    %102 = arith.addf %99, %101 : vector<8x48xf32>
    %cst_34 = arith.constant dense<0.000000e+00> : vector<8xf32>
    %103 = vector.multi_reduction <add>, %102, %cst_34 [1] : vector<8x48xf32> to vector<8xf32>
    %104 = vector.shape_cast %103 : vector<8xf32> to vector<8x1xf32>
    %cst_35 = arith.constant -0.0334049463 : f32
    %105 = vector.broadcast %cst_35 : f32 to vector<8x1xf32>
    %106 = arith.addf %104, %105 : vector<8x1xf32>
    %c0_36 = arith.constant 0 : index
    %c0_37 = arith.constant 0 : index
    %107 = vector.load %arg2[%c0_36, %c0_37] : memref<8x1xf32, #tpu.memory_space<vmem>>, vector<8x1xf32>
    tpu.vector_store %arg2[%c0_36, %c0_37], %106 {strides = array<i32>} : memref<8x1xf32, #tpu.memory_space<vmem>>, vector<8x1xf32>,
    return
  }
}

</mosaic_0001>

<bundles_post_ra>
// kernel: tpu_custom_call.1
= control target key start
LH: loop header
LB: loop body
LE: loop exit
PB: predicated region body
PF: predicated region fallthrough
CT: control target
= control target key end

     0   :  { %vm64_vm0 = vcmask 1043456   ;;  %v619_v1 = vmov 0.0   ;;  %vm620_vm1 = vmmov 0   ;;  %s834_s0 = inlined_call_operand.vmem [shape: f32[8,24], index: 0, kind: input, shape index: {}]   ;;  %s835_s1 = inlined_call_operand.vmem [shape: f32[296,48], index: 1, kind: input, shape index: {}]   ;;  %s836_s2 = inlined_call_operand.vmem [shape: f32[8,1], index: 2, kind: output, shape index: {0}]   ;;  %s837_s3 = inlined_call_operand.hbm [shape: f32[2,8,48], index: 3, kind: output, shape index: {1}]  }
   0x1   :  { %v18_v0 = vld [vmem:[%s835_s1 + $0x10] sm:$0xff]  ;;  %522 = vmatprep.subr.bf16.mxu1 %v619_v1  ;;  %v16_v3 = vld [vmem:[%s835_s1] sm:$0xff]  ;;  %v17_v4 = vld [vmem:[%s835_s1 + $0x8] sm:$0xff]  ;;  %526 = vmatprep.mubr.msk.bf16.mxu1 %vm620_vm1, %v619_v1 }
   0x2   :  { %v55_v2 = vpack.c.bf16 %v18_v0, %v18_v0  ;;  %v21_v5 = vld [vmem:[%s835_s1 + $0x28] sm:$0xff]  ;;  %538 = vmatprep.subr.bf16.mxu0 %v619_v1  ;;  %544 = vmatprep.mubr.msk.bf16.mxu0 %vm620_vm1, %v619_v1 }
   0x3   :  { %9 = vsyncpa [#allocation3], 0  ;;  %v54_v7 = vpack.c.bf16 %v17_v4, %v16_v3  ;;  %v15_v8 = vld [vmem:[%s834_s0] sm:$0xff]  ;;  %v109_v9 = vpack.c.bf16 %v21_v5, %v21_v5  ;;  %vm60_vm2 = vcmask 195584   ;;  %v19_v12 = vld [vmem:[%s835_s1 + $0x18] sm:$0xff]  ;;  %v56_v24 = vlaneseq }
   0x4   :  { %v66_v6 = vsel %vm64_vm0, %v55_v2, 0  ;;  %v53_v10 = vpack.c.bf16 %v15_v8, %v15_v8  ;;  %v20_v13 = vld [vmem:[%s835_s1 + $0x20] sm:$0xff]  ;;  %v26_v15 = vld [vmem:[%s835_s1 + $0x50] sm:$0xff]  ;;  %v27_v16 = vld [vmem:[%s835_s1 + $0x58] sm:$0xff]  ;;  %vm162_vm3 = vcmask 392192  }
   0x5   :  { %523 = vmatpush3.bf16.msra.mxu1 %v66_v6  ;;  %v115_v11 = vsel %vm64_vm0, %v109_v9, 0  ;;  %v108_v14 = vpack.c.bf16 %v20_v13, %v19_v12  ;;  %v161_v17 = vpack.c.bf16 %v27_v16, %v26_v15  ;;  %v24_v18 = vld [vmem:[%s835_s1 + $0x40] sm:$0xff]  ;;  %v25_v19 = vld [vmem:[%s835_s1 + $0x48] sm:$0xff]  ;;  %v22_v21 = vld [vmem:[%s835_s1 + $0x30] sm:$0xff]  ;;  %v702_v25 = vshrl.u32 %v56_v24, 7 }
   0x6   :  { %524 = vmatprep.subr.bf16.mxu1 %v619_v1  ;;  %v160_v20 = vpack.c.bf16 %v25_v19, %v24_v18  ;;  %v23_v22 = vld [vmem:[%s835_s1 + $0x38] sm:$0xff]  ;;  %v709_v29 = vld [vmem:[%s835_s1 + $0x120] sm:$0xff]  ;;  %v38_v43 = vld [vmem:[%s835_s1 + $0xb0] sm:$0xff] }
   0x7   :  { %539 = vmatpush3.bf16.msra.mxu0 %v161_v17  ;;  %v159_v23 = vpack.c.bf16 %v23_v22, %v22_v21  ;;  %v58_v27 = vsub.s32 0, %v702_v25  ;;  %v112_v28 = vsub.s32 1, %v702_v25  ;;  %v39_v44 = vld [vmem:[%s835_s1 + $0xb8] sm:$0xff]  ;;  %v32_v46 = vld [vmem:[%s835_s1 + $0x80] sm:$0xff]  ;;  %v33_v47 = vld [vmem:[%s835_s1 + $0x88] sm:$0xff] }
   0x8   :  { %540 = vmatprep.subr.bf16.mxu0 %v619_v1  ;;  %v281_v45 = vpack.c.bf16 %v39_v44, %v38_v43  ;;  %v231_v48 = vpack.c.bf16 %v33_v47, %v32_v46  ;;  %v36_v49 = vld [vmem:[%s835_s1 + $0xa0] sm:$0xff]  ;;  %v37_v50 = vld [vmem:[%s835_s1 + $0xa8] sm:$0xff]  ;;  %v30_v52 = vld [vmem:[%s835_s1 + $0x70] sm:$0xff] }
   0x9   :  { %525 = vmatpush3.bf16.msra.mxu1 %v54_v7  ;;  %v59_v32 = vrot.slane %v709_v29, %v58_v27  ;;  %v113_v33 = vrot.slane %v709_v29, %v112_v28  ;;  %v280_v51 = vpack.c.bf16 %v37_v50, %v36_v49  ;;  %v31_v53 = vld [vmem:[%s835_s1 + $0x78] sm:$0xff]  ;;  %v34_v55 = vld [vmem:[%s835_s1 + $0x90] sm:$0xff]  ;;  %v28_v58 = vld [vmem:[%s835_s1 + $0x60] sm:$0xff]  ;;  %v284_v49 = vsub.s32 3, %v702_v25 }
   0xa   :  { %530 = vmatprep.subr.bf16.mxu1 %v619_v1  ;;  %v230_v54 = vpack.c.bf16 %v31_v53, %v30_v52  ;;  %v35_v56 = vld [vmem:[%s835_s1 + $0x98] sm:$0xff]  ;;  %v29_v59 = vld [vmem:[%s835_s1 + $0x68] sm:$0xff]  ;;  %v50_v21 = vld [vmem:[%s835_s1 + $0x110] sm:$0xff] }
   0xb   :  { %541 = vmatpush3.bf16.msra.mxu0 %v160_v20  ;;  %v279_v57 = vpack.c.bf16 %v35_v56, %v34_v55  ;;  %v229_v60 = vpack.c.bf16 %v29_v59, %v28_v58  ;;  %v51_v22 = vld [vmem:[%s835_s1 + $0x118] sm:$0xff]  ;;  %v44_v24 = vld [vmem:[%s835_s1 + $0xe0] sm:$0xff]  ;;  %v41_v46 = vld [vmem:[%s835_s1 + $0xc8] sm:$0xff] }
   0xc   :  { %527 = vmatmul.mubr.msk.bf16.vlgmr.msra.gmra.mxu1 %vm60_vm2, %v53_v10  ;;  %542 = vmatprep.subr.bf16.mxu0 %v619_v1  ;;  %v404_v28 = vpack.c.bf16 %v51_v22, %v50_v21  ;;  %v43_v43 = vld [vmem:[%s835_s1 + $0xd8] sm:$0xff] }
   0xd   :  { %531 = vmatpush3.bf16.msra.mxu1 %v115_v11  ;;  %534 = vmatprep.mubr.msk.bf16.mxu1 %vm620_vm1, %v619_v1 }
   0xe   :  { %532 = vmatprep.subr.bf16.mxu1 %v619_v1 }
   0xf   :  { %543 = vmatpush3.bf16.msra.mxu0 %v159_v23 }
  0x10   :  { %558 = vmatprep.subr.bf16.mxu0 %v619_v1 }
  0x11   :  { %533 = vmatpush3.bf16.msra.mxu1 %v108_v14 }
  0x12   :  { %548 = vmatprep.subr.bf16.mxu1 %v619_v1 }
  0x14   :  { %535 = vmatmul.mubr.msk.bf16.vlgmr.msra.gmra.mxu1 %vm60_vm2, %v53_v10 }
  0x15   :  { %554 = vmatprep.mubr.msk.bf16.mxu1 %vm620_vm1, %v619_v1  ;;  %549 = vmatpush3.bf16.msra.mxu1 %v231_v48  ;;  %v234_v48 = vsub.s32 2, %v702_v25 }
  0x16   :  { %550 = vmatprep.subr.bf16.mxu1 %v619_v1 }
  0x17   :  { %v235_v50 = vrot.slane %v709_v29, %v234_v48 }
  0x19   :  { %551 = vmatpush3.bf16.msra.mxu1 %v230_v54 }
  0x1a   :  { %552 = vmatprep.subr.bf16.mxu1 %v619_v1 }
  0x1d   :  { %553 = vmatpush3.bf16.msra.mxu1 %v229_v60 }
  0x1e   :  { %568 = vmatprep.subr.bf16.mxu1 %v619_v1 }
  0xcc   :  { %v102_v26 = vpop.f32.mrf.mxu1 }
  0xcd   :  { %v103_v36 = vadd.f32 %v102_v26, %v59_v32  ;;  %v45_v26 = vld [vmem:[%s835_s1 + $0xe8] sm:$0xff]  ;;  %v48_v32 = vld [vmem:[%s835_s1 + $0x100] sm:$0xff] }
  0xce   :  { %v528_v30 = vpop.f32.mrf.mxu1 }
  0xd0   :  { %v105_v31 = vpop.f32.mrf.mxu1 }
  0xd2   :  { %v529_v34 = vpop.f32.mrf.mxu1 }
  0xd3   :  { %v330_v34 = vpack.c.bf16 %v45_v26, %v44_v24 }
  0xd4   :  { %v151_v35 = vpop.f32.mrf.mxu1 }
  0xd5   :  { %v152_v37 = vadd.f32 %v151_v35, %v113_v33  ;;  %v49_v33 = vld [vmem:[%s835_s1 + $0x108] sm:$0xff] }
  0xd6   :  { %v536_v38 = vpop.f32.mrf.mxu1 }
  0xd7   :  { %v157_v39 = vmax.f32 %v103_v36, %v152_v37  ;;  %v403_v36 = vpack.c.bf16 %v49_v33, %v48_v32  ;;  %v46_v38 = vld [vmem:[%s835_s1 + $0xf0] sm:$0xff]  ;;  %v458_v32 = vsub.s32 5, %v702_v25 }
  0xd8   :  { %v154_v40 = vpop.f32.mrf.mxu1 }
  0xd9   :  { %v158_v41 = vpack.c.bf16 %v157_v39, %v157_v39  ;;  %v47_v39 = vld [vmem:[%s835_s1 + $0xf8] sm:$0xff] }
  0xda   :  { %v537_v42 = vpop.f32.mrf.mxu1  ;;  %v402_v40 = vpack.c.bf16 %v47_v39, %v46_v38 }
  0xdb   :  { %545 = vmatmul.mubr.msk.bf16.vlgmr.msra.gmra.mxu0 %vm162_vm3, %v158_v41  ;;  %v42_v42 = vld [vmem:[%s835_s1 + $0xd0] sm:$0xff] }
  0xdc   :  { %564 = vmatprep.mubr.msk.bf16.mxu0 %vm620_vm1, %v619_v1  ;;  %559 = vmatpush3.bf16.msra.mxu0 %v281_v45  ;;  %v329_v44 = vpack.c.bf16 %v43_v43, %v42_v42  ;;  %v40_v45 = vld [vmem:[%s835_s1 + $0xc0] sm:$0xff]  ;;  %s621_s1 = smov [#allocation2]  }
  0xdd   :  { %560 = vmatprep.subr.bf16.mxu0 %v619_v1  ;;  %v328_v47 = vpack.c.bf16 %v41_v46, %v40_v45  ;;  %s475_s4 = sshll.u32 %s621_s1, 4  ;;  %s476_s4 = int_to_ptr.vmem [resolvable:$true] %s475_s4 }
  0xde   :  { %s597_s5 = scalar_lea.vmem %s476_s4, 256  ;;  %p602_p1 = scmp.lt.s32.totalorder %s476_s4, %s476_s4 }
  0xdf   :  { %p598_p0 = scmp.ne.s32.totalorder %s476_s4, %s597_s5  ;;  %p603_p2 = scmp.lt.s32.totalorder %s597_s5, %s597_s5 }
  0xe0   :  { %561 = vmatpush3.bf16.msra.mxu0 %v280_v51  ;;  %v285_v51 = vrot.slane %v709_v29, %v284_v49 }
  0xe1   :  { %562 = vmatprep.subr.bf16.mxu0 %v619_v1  ;;  %p604_p3 = por %p603_p2, %p602_p1 }
  0xe3   :  { %p605_p4 = pnand %p604_p3, %p598_p0 }
  0xe4   :  { %563 = vmatpush3.bf16.msra.mxu0 %v279_v57 }
  0xe5   :  { %578 = vmatprep.subr.bf16.mxu0 %v619_v1 }
 0x19b   :  { %v200_v61 = vpop.f32.mrf.mxu0 }
 0x19c   :  { %v206_v62 = vsel %vm162_vm3, %v200_v61, 0.0 }
 0x19d   :  { %v207_v63 = vrot.slane %v206_v62, 4  ;;  %v546_v0 = vpop.f32.mrf.mxu0 }
 0x19f   :  { %v208_v2 = vadd.f32 %v207_v63, %v206_v62  ;;  %v203_v3 = vpop.f32.mrf.mxu0 }
 0x1a1   :  { %v209_v4 = vrot.slane %v208_v2, 2  ;;  %v547_v5 = vpop.f32.mrf.mxu0 }
 0x1a3   :  { %v210_v6 = vadd.f32 %v209_v4, %v208_v2 }
 0x1a5   :  { %v211_v7 = vrot.slane %v210_v6, 1 }
 0x1a7   :  { %v212_v8 = vadd.f32 %v211_v7, %v210_v6 }
 0x1a9   :  { %v214_v9 = vmul.f32 0.125, %v212_v8 }
 0x1ab   :  { %v215_v10 = vsub.f32 %v200_v61, %v214_v9 }
 0x1ad   :  { %v216_v11 = vmul.f32 %v215_v10, %v215_v10 }
 0x1af   :  { %v217_v12 = vsel %vm162_vm3, %v216_v11, 0.0 }
 0x1b0   :  { %v218_v13 = vrot.slane %v217_v12, 4 }
 0x1b2   :  { %v219_v14 = vadd.f32 %v218_v13, %v217_v12 }
 0x1b4   :  { %v220_v15 = vrot.slane %v219_v14, 2 }
 0x1b6   :  { %v221_v16 = vadd.f32 %v220_v15, %v219_v14 }
 0x1b8   :  { %v222_v17 = vrot.slane %v221_v16, 1 }
 0x1ba   :  { %v223_v18 = vadd.f32 %v222_v17, %v221_v16 }
 0x1bc   :  { %v224_v19 = vmul.f32 0.125, %v223_v18 }
 0x1be   :  { %v225_v20 = vadd.f32 1e-05, %v224_v19 }
 0x1c0   :  { %593 = vrsqrt.f32 %v225_v20 }
 0x1cd   :  { %v594_v23 = vpop.eup %593 }
 0x1ce   :  { %v772_v27 = vmul.f32 %v594_v23, %v215_v10 }
 0x1d0   :  { %v228_v30 = vpack.c.bf16 %v772_v27, %v772_v27  ;;  %v494_v31 = vadd.f32 0.03727279, %v772_v27  ;;  %398 = vst.msk [vmem:[#allocation2] sm:$0xff] %vm162_vm3, %v772_v27 }
 0x1d2   :  { %v396_v35 = vmul.f32 -0.7, %v494_v31  ;;  %555 = vmatmul.mubr.msk.bf16.vlgmr.msra.gmra.mxu1 %vm162_vm3, %v228_v30  ;;  %565 = vmatmul.mubr.msk.bf16.vlgmr.msra.gmra.mxu0 %vm162_vm3, %v228_v30  ;;  %v451_v30 = vsub.s32 4, %v702_v25 }
 0x1d3   :  { %579 = vmatpush3.bf16.msra.mxu0 %v404_v28  ;;  %584 = vmatprep.mubr.msk.bf16.mxu0 %vm620_vm1, %v619_v1 }
 0x1d4   :  { %v397_v37 = vmax.f32 %v494_v31, %v396_v35  ;;  %580 = vmatprep.subr.bf16.mxu0 %v619_v1  ;;  %569 = vmatpush3.bf16.msra.mxu1 %v330_v34  ;;  %v452_v31 = vrot.slane %v709_v29, %v451_v30 }
 0x1d5   :  { %570 = vmatprep.subr.bf16.mxu1 %v619_v1  ;;  %574 = vmatprep.mubr.msk.bf16.mxu1 %vm620_vm1, %v619_v1 }
 0x1d6   :  { %400 = vst.msk [vmem:[#allocation2 + $0x8] sm:$0xff] %vm162_vm3, %v397_v37  ;;  %v401_v41 = vpack.c.bf16 %v397_v37, %v397_v37 }
 0x1d7   :  { %581 = vmatpush3.bf16.msra.mxu0 %v403_v36  ;;  %v459_v36 = vrot.slane %v709_v29, %v458_v32 }
 0x1d8   :  { %582 = vmatprep.subr.bf16.mxu0 %v619_v1  ;;  %571 = vmatpush3.bf16.msra.mxu1 %v329_v44 }
 0x1d9   :  { %572 = vmatprep.subr.bf16.mxu1 %v619_v1 }
 0x1db   :  { %583 = vmatpush3.bf16.msra.mxu0 %v402_v40 }
 0x1dc   :  { %573 = vmatpush3.bf16.msra.mxu1 %v328_v47 }
 0x1de   :  { %585 = vmatmul.mubr.msk.bf16.vlgmr.msra.gmra.mxu0 %vm162_vm3, %v401_v41 }
 0x292   :  { %v273_v52 = vpop.f32.mrf.mxu1  ;;  %v320_v1 = vpop.f32.mrf.mxu0 }
 0x293   :  { %v274_v53 = vadd.f32 %v273_v52, %v235_v50  ;;  %v321_v54 = vadd.f32 %v320_v1, %v285_v51 }
 0x294   :  { %v556_v55 = vpop.f32.mrf.mxu1  ;;  %v566_v56 = vpop.f32.mrf.mxu0 }
 0x295   :  { %v326_v57 = vmax.f32 %v274_v53, %v321_v54 }
 0x296   :  { %v276_v58 = vpop.f32.mrf.mxu1  ;;  %v323_v59 = vpop.f32.mrf.mxu0 }
 0x297   :  { %v327_v60 = vpack.c.bf16 %v326_v57, %v326_v57 }
 0x298   :  { %v557_v61 = vpop.f32.mrf.mxu1  ;;  %v567_v62 = vpop.f32.mrf.mxu0 }
 0x299   :  { %575 = vmatmul.mubr.msk.bf16.vlgmr.msra.gmra.mxu1 %vm162_vm3, %v327_v60 }
 0x29e   :  { %v442_v63 = vpop.f32.mrf.mxu0 }
 0x29f   :  { %v448_v37 = vmul.f32 %v442_v63, %v772_v27 }
 0x2a0   :  { %v586_v0 = vpop.f32.mrf.mxu0 }
 0x2a2   :  { %v445_v2 = vpop.f32.mrf.mxu0 }
 0x2a4   :  { %v587_v3 = vpop.f32.mrf.mxu0 }
 0x359   :  { %v368_v4 = vpop.f32.mrf.mxu1 }
 0x35a   :  { %v374_v5 = vsel %vm162_vm3, %v368_v4, 0.0 }
 0x35b   :  { %v375_v6 = vrot.slane %v374_v5, 4  ;;  %v576_v7 = vpop.f32.mrf.mxu1 }
 0x35d   :  { %v376_v8 = vadd.f32 %v375_v6, %v374_v5  ;;  %v371_v9 = vpop.f32.mrf.mxu1 }
 0x35f   :  { %v377_v10 = vrot.slane %v376_v8, 2  ;;  %v577_v11 = vpop.f32.mrf.mxu1 }
 0x361   :  { %v378_v12 = vadd.f32 %v377_v10, %v376_v8 }
 0x363   :  { %v379_v13 = vrot.slane %v378_v12, 1 }
 0x365   :  { %v380_v14 = vadd.f32 %v379_v13, %v378_v12 }
 0x367   :  { %v381_v15 = vmul.f32 0.125, %v380_v14 }
 0x369   :  { %v382_v16 = vsub.f32 %v368_v4, %v381_v15 }
 0x36b   :  { %v383_v17 = vmul.f32 %v382_v16, %v382_v16 }
 0x36d   :  { %v384_v18 = vsel %vm162_vm3, %v383_v17, 0.0 }
 0x36e   :  { %v385_v19 = vrot.slane %v384_v18, 4 }
 0x370   :  { %v386_v20 = vadd.f32 %v385_v19, %v384_v18 }
 0x372   :  { %v387_v21 = vrot.slane %v386_v20, 2 }
 0x374   :  { %v388_v22 = vadd.f32 %v387_v21, %v386_v20 }
 0x376   :  { %v389_v23 = vrot.slane %v388_v22, 1 }
 0x378   :  { %v390_v24 = vadd.f32 %v389_v23, %v388_v22 }
 0x37a   :  { %v391_v26 = vmul.f32 0.125, %v390_v24 }
 0x37c   :  { %v392_v28 = vadd.f32 1e-05, %v391_v26 }
 0x37e   :  { %595 = vrsqrt.f32 %v392_v28 }
 0x38b   :  { %v596_v33 = vpop.eup %595 }
 0x38c   :  { %v394_v34 = vmul.f32 %v596_v33, %v382_v16 }
 0x38e   :  { %v453_v35 = vmul.f32 %v452_v31, %v394_v34  ;;  %v460_v40 = vmul.f32 %v459_v36, %v394_v34 }
 0x390   :  { %v454_v38 = vmul.f32 %v453_v35, %v394_v34 }
 0x392   :  { %v455_v39 = vadd.f32 %v454_v38, %v448_v37 }
 0x394   :  { %v461_v41 = vadd.f32 %v460_v40, %v455_v39 }
 0x396   :  { %v462_v42 = vsel %vm162_vm3, %v461_v41, 0.0 }
 0x397   :  { %463 = vadd.xlane.f32.xlu0 %v462_v42 }
 0x398   :  { %608 = shalt.err (!%p605_p4)
}
 0x399   :  { %s622_s6 = smov 128   ;;  %s623_s7 = smov 8   ;;  %vm466_vm4 = vcmask 7168  }
 0x39a   :  { %481 = dma.vmem_to_hbm [thread:$0]  %s476_s4, 256, %s837_s3, [#allocation3], %s622_s6, %s622_s6, %s623_s7  }
 0x420   :  { %v464_v25 = vpop.xlane.xlu0 %463 }
 0x421   :  { %v465_v29 = vadd.f32 -0.033404946, %v464_v25 }
 0x423   :  { %467 = vst.msk [vmem:[%s836_s2] sm:$0xff] %vm466_vm4, %v465_v29 }
 0x424   :  { %617 = dma.done.wait [#allocation3], 256  }
 0x425   :  { %618 = vsyncadd [#allocation3], 4294967040 }
 0x426   :  { %487 = vsyncpa [#allocation3], 1 }

</bundles_post_ra>
